<compile_context>
chip_gen: v5e
topology: v5e:2x2
jax: 0.10.0
libtpu: 0.0.40
codegen_flags: <defaults>
</compile_context>

<pallas_src>
import jax
import jax.numpy as jnp
import numpy as np
from jax.experimental import pallas as pl
from jax.experimental.pallas import tpu as pltpu

LSIZE = 12  # w_size in the PyTorch module


# --------------------------------------------------------------------------
# Pallas kernel: per-sample fused block
# --------------------------------------------------------------------------
def _style_block_kernel(patches_ref, w_ref, gamma_ref, beta_ref, out_ref):
    """Fused per-sample block: phase matmuls -> GroupNorm(C,C) -> style affine -> LeakyReLU.

    patches_ref: [1, P, Keff, HWp] bf16  per-sample, phase-major patches
    w_ref:       [P, Cout, Keff]   bf16  per-phase weight matrices
    gamma_ref:   [1, Cout, 1]      f32   GroupNorm weight fused with style scale
    beta_ref:    [1, Cout, 1]      f32   GroupNorm bias   fused with style bias
    out_ref:     [1, P, Cout, HWp] f32
    """
    P, Cout, Keff = w_ref.shape
    HWp = patches_ref.shape[-1]
    inv_cnt = 1.0 / float(P * HWp)

    # One bf16 MXU pass per phase, f32 accumulation.  (At scaled Cout/NHW these
    # results would land in a VMEM scratch accumulator + an NHW-tiled grid; at
    # this size vregs are plenty.)
    ys = [jnp.dot(w_ref[ph], patches_ref[0, ph],
                  preferred_element_type=jnp.float32) for ph in range(P)]

    # Single-pass GroupNorm(C, C) statistics over the full sample (all phases),
    # kept in f32.
    tot = ys[0]
    tot_sq = ys[0] * ys[0]
    for ph in range(1, P):
        tot = tot + ys[ph]
        tot_sq = tot_sq + ys[ph] * ys[ph]
    mean = jnp.sum(tot, axis=-1, keepdims=True) * inv_cnt              # [Cout, 1]
    var = jnp.maximum(jnp.sum(tot_sq, axis=-1, keepdims=True) * inv_cnt
                      - mean * mean, 0.0)                              # clamp fp cancellation
    inv_std = jax.lax.rsqrt(var + 1e-6)                                # eps = 1e-6 (module spec)

    # Fold normalization + (GroupNorm affine * style affine) into one FMA.
    g = gamma_ref[0] * inv_std                                         # [Cout, 1]
    b = beta_ref[0] - mean * g                                         # [Cout, 1]
    for ph in range(P):
        z = ys[ph] * g + b
        out_ref[0, ph] = jnp.maximum(z, 0.2 * z)                       # LeakyReLU(0.2)


# --------------------------------------------------------------------------
# Wrapper glue (plain JAX): sub-pixel phase decomposition / im2col
# --------------------------------------------------------------------------
def _phase_decompose(x, W, stride, padding):
    """Sub-pixel (phase) decomposition of ConvTranspose2d into stride**2 small
    correlations on the *non-dilated* input (plain im2col when stride == 1).

    x: [N, Cin, H, W] f32, W: [Cin, Cout, kh, kw] (PyTorch ConvTranspose2d weight).

    Returns:
      patches [N, P, Keff, Hm*Wm]  P = stride**2 output phases
      wstack  [P, Cout, Keff]      per-phase weight matrices (K order (cin, ta, tb))
      Hout, Wout, Hm, Wm
    """
    N, Cin, H, Wsp = x.shape
    _, Cout, kh, kw = W.shape
    s = stride
    Hout = (H - 1) * s - 2 * padding + kh
    Wout = (Wsp - 1) * s - 2 * padding + kw
    assert Hout % s == 0 and Wout % s == 0, "phase decomposition needs stride | output size"
    Hm, Wm = Hout // s, Wout // s

    # Output pixel i (phase po = i % s) receives weight taps a with
    # a == (po + padding) mod s, reading input row  mi + (po + padding - a)//s.
    def taps(k, po):
        return [(a, (po + padding - a) // s) for a in range(k)
                if (a - po - padding) % s == 0]

    taps_h = [taps(kh, po) for po in range(s)]
    taps_w = [taps(kw, qo) for qo in range(s)]
    n_ta = max(len(t) for t in taps_h)
    n_tb = max(len(t) for t in taps_w)
    Keff = Cin * n_ta * n_tb

    off_h = [o for t in taps_h for _, o in t]
    off_w = [o for t in taps_w for _, o in t]
    pad_lo_h = max(0, -min(off_h))
    pad_hi_h = max(0, Hm - 1 + max(off_h) - (H - 1))
    pad_lo_w = max(0, -min(off_w))
    pad_hi_w = max(0, Wm - 1 + max(off_w) - (Wsp - 1))
    xp = jnp.pad(x, ((0, 0), (0, 0), (pad_lo_h, pad_hi_h), (pad_lo_w, pad_hi_w)))

    patch_phases, w_phases = [], []
    for po in range(s):
        for qo in range(s):
            rows, w_entries = [], []
            for ta in range(n_ta):
                for tb in range(n_tb):
                    if ta < len(taps_h[po]) and tb < len(taps_w[qo]):
                        a, oa = taps_h[po][ta]
                        b, ob = taps_w[qo][tb]
                        rows.append(xp[:, :, pad_lo_h + oa:pad_lo_h + oa + Hm,
                                            pad_lo_w + ob:pad_lo_w + ob + Wm])
                        w_entries.append(W[:, :, a, b].T)              # [Cout, Cin]
                    else:                                              # ragged phase -> zero tap
                        rows.append(jnp.zeros((N, Cin, Hm, Wm), x.dtype))
                        w_entries.append(jnp.zeros((Cout, Cin), W.dtype))
            # K order = (cin, ta, tb) in both the patches and the weight matrix.
            patch_phases.append(jnp.stack(rows, axis=2).reshape(N, Keff, Hm * Wm))
            w_phases.append(jnp.stack(w_entries, axis=-1).reshape(Cout, Keff))
    patches = jnp.stack(patch_phases, axis=1)          # [N, P, Keff, Hm*Wm]
    wstack = jnp.stack(w_phases, axis=0)               # [P, Cout, Keff]
    return patches, wstack, Hout, Wout, Hm, Wm


def style_conv_transpose_block(x, style_scale, style_bias, p, stride, padding):
    """One StyleConvTranspose2DBlock.  x: [N, Cin, H, W] -> [N, Cout, Hout, Wout]."""
    W = p["conv_w"]                       # [Cin, Cout, kh, kw] (PyTorch ConvTranspose2d)
    gn_w, gn_b = p["gn_w"], p["gn_b"]     # [Cout], [Cout]
    N = x.shape[0]
    _, Cout, _, _ = W.shape

    patches, wstack, Hout, Wout, Hm, Wm = _phase_decompose(x, W, stride, padding)
    P, _, Keff = wstack.shape
    HWp = Hm * Wm

    # bf16 matmul operands (single MXU pass); stats/affine stay f32 in-kernel.
    patches = patches.astype(jnp.bfloat16)
    wstack = wstack.astype(jnp.bfloat16)

    # GroupNorm affine folded with the per-sample style affine -> [N, Cout, 1].
    gamma_f = (gn_w[None, :] * style_scale)[..., None].astype(jnp.float32)
    beta_f = (gn_b[None, :] * style_scale + style_bias)[..., None].astype(jnp.float32)

    out = pl.pallas_call(
        _style_block_kernel,
        out_shape=jax.ShapeDtypeStruct((N, P, Cout, HWp), jnp.float32),
        grid=(N,),
        in_specs=[
            pl.BlockSpec((1, P, Keff, HWp), lambda n: (n, 0, 0, 0)),
            pl.BlockSpec((P, Cout, Keff), lambda n: (0, 0, 0)),
            pl.BlockSpec((1, Cout, 1), lambda n: (n, 0, 0)),
            pl.BlockSpec((1, Cout, 1), lambda n: (n, 0, 0)),
        ],
        out_specs=pl.BlockSpec((1, P, Cout, HWp), lambda n: (n, 0, 0, 0)),
        compiler_params=pltpu.CompilerParams(
            dimension_semantics=("parallel",)),
    )(patches, wstack, gamma_f, beta_f)

    # De-interleave the output phases back to spatial (cheap XLA reshape/transpose):
    # out[n, oc, s*mi + po, s*mj + qo] = kernel_out[n, po*s + qo, oc, mi*Wm + mj].
    s = stride
    out = out.reshape(N, s, s, Cout, Hm, Wm).transpose(0, 3, 4, 1, 5, 2)
    return out.reshape(N, Cout, Hout, Wout)


def style_conv_transpose_blocks(x, wvec, params, strides, paddings):
    """x: [N, Cin, H, W] (NCHW), wvec: [N, LSIZE].  Returns NCHW."""
    for p, s, pad in zip(params, strides, paddings):
        Cout = p["conv_w"].shape[1]
        # Hoisted style-conditioning Linear: tiny [N,12]@[12,2*Cout] XLA op.
        wout = wvec @ p["cond_w"].T + p["cond_b"]       # [N, 2*Cout]
        scale, bias = wout[:, :Cout], wout[:, Cout:]
        x = style_conv_transpose_block(x, scale, bias, p, s, pad)
    return x


def init_params(key, widths, kernel_sizes, fchannel=1, w_size=LSIZE):
    """Deterministic synthetic parameters (GroupNorm affine uses PyTorch defaults)."""
    params = []
    in_c = fchannel
    for width, k in zip(widths, kernel_sizes):
        key, k1, k2, k3, k4 = jax.random.split(key, 5)
        params.append(dict(
            conv_w=0.2 * jax.random.normal(k1, (in_c, width, k, k), jnp.float32),
            conv_b=0.1 * jax.random.normal(k2, (width,), jnp.float32),
            gn_w=jnp.ones((width,), jnp.float32),
            gn_b=jnp.zeros((width,), jnp.float32),
            cond_w=0.2 * jax.random.normal(k3, (2 * width, w_size), jnp.float32),
            cond_b=0.1 * jax.random.normal(k4, (2 * width,), jnp.float32),
        ))
        in_c = width
    return params


# --------------------------------------------------------------------------
# Pure-JAX (XLA conv) references for verification
# --------------------------------------------------------------------------
def _ref_block(x, scale, bias, p, stride, padding, matmul_dtype=jnp.float32):
    """One block via lax.conv_general_dilated.  matmul_dtype=bf16 gives a
    reference whose matmul operands match the kernel bit-for-bit (f32 accum)."""
    W, b = p["conv_w"], p["conv_b"]
    _, Cout, kh, kw = W.shape
    w_conv = jnp.flip(W, axis=(2, 3)).transpose(1, 0, 2, 3)   # OIHW correlation weight
    pad_h, pad_w = kh - 1 - padding, kw - 1 - padding
    prec = jax.lax.Precision.HIGHEST if matmul_dtype == jnp.float32 else None
    y = jax.lax.conv_general_dilated(
        x.astype(matmul_dtype), w_conv.astype(matmul_dtype),
        window_strides=(1, 1), padding=[(pad_h, pad_h), (pad_w, pad_w)],
        lhs_dilation=(stride, stride),
        dimension_numbers=("NCHW", "OIHW", "NCHW"),
        preferred_element_type=jnp.float32, precision=prec)
    y = y + b[None, :, None, None]
    mean = y.mean(axis=(2, 3), keepdims=True)
    var = ((y - mean) ** 2).mean(axis=(2, 3), keepdims=True)
    y = (y - mean) * jax.lax.rsqrt(var + 1e-6)
    y = y * p["gn_w"][None, :, None, None] + p["gn_b"][None, :, None, None]
    y = y * scale[:, :, None, None] + bias[:, :, None, None]
    return jnp.where(y >= 0, y, 0.2 * y)


def _ref_blocks(x, wvec, params, strides, paddings, matmul_dtype=jnp.float32):
    for p, s, pad in zip(params, strides, paddings):
        Cout = p["conv_w"].shape[1]
        wout = wvec @ p["cond_w"].T + p["cond_b"]
        scale, bias = wout[:, :Cout], wout[:, Cout:]
        x = _ref_block(x, scale, bias, p, s, pad, matmul_dtype=matmul_dtype)
    return x


if __name__ == "__main__":
    # Module config: fchannel=1, widths=[4, 8], kernels=[4, 3], strides=[2, 1],
    # paddings=[1, 1], activation='leaky_relu'.
    widths = [4, 8]
    kernel_sizes = [4, 3]
    strides = [2, 1]
    paddings = [1, 1]

    key = jax.random.PRNGKey(0)
    kx, kw_, kp = jax.random.split(key, 3)
    x = jax.random.normal(kx, (2, 1, 8, 8), jnp.float32)       # NCHW input
    wvec = jax.random.normal(kw_, (2, LSIZE), jnp.float32)     # style vectors
    params = init_params(kp, widths, kernel_sizes, fchannel=1)

    out = style_conv_transpose_blocks(x, wvec, params, strides, paddings)
    out = jax.block_until_ready(out)

    # --- per-block verification against a matched bf16-operand / f32-accum
    #     XLA reference (same truncation as the kernel -> tight tolerance) ---
    xin = x
    for p, s, pad in zip(params, strides, paddings):
        Cout = p["conv_w"].shape[1]
        wout = wvec @ p["cond_w"].T + p["cond_b"]
        scale, bias = wout[:, :Cout], wout[:, Cout:]
        kern_b = jax.block_until_ready(
            style_conv_transpose_block(xin, scale, bias, p, s, pad))
        ref_b = _ref_block(xin, scale, bias, p, s, pad, matmul_dtype=jnp.bfloat16)
        np.testing.assert_allclose(np.asarray(kern_b), np.asarray(ref_b),
                                   rtol=1e-4, atol=1e-4)
        xin = kern_b

    # --- coarse end-to-end sanity vs. the full-f32 (HIGHEST) module reference ---
    ref_full = _ref_blocks(x, wvec, params, strides, paddings,
                           matmul_dtype=jnp.float32)
    np.testing.assert_allclose(np.asarray(out), np.asarray(ref_full),
                               rtol=1e-1, atol=1e-1)

    print("KERNEL_OK")
</pallas_src>

<mosaic_0001>
module attributes {stable_mosaic.version = 11 : i64} {
  func.func @_style_block_kernel(%arg0: i32, %arg1: memref<1x4x4x64xbf16, #tpu.memory_space<vmem>>, %arg2: memref<4x4x4xbf16, #tpu.memory_space<vmem>>, %arg3: memref<1x4x1xf32, #tpu.memory_space<vmem>>, %arg4: memref<1x4x1xf32, #tpu.memory_space<vmem>>, %arg5: memref<1x4x4x64xf32, #tpu.memory_space<vmem>>) attributes {dimension_semantics = [#tpu.dimension_semantics<parallel>], iteration_bounds = array<i64: 2>, scalar_prefetch = 0 : i64, scratch_operands = 0 : i64, tpu.core_type = #tpu.core_type<tc>, window_params = [{transform_indices = @transform_0, window_bounds = array<i64: 1, 4, 4, 64>}, {pipeline_mode = #tpu.pipeline_mode<synchronous>, transform_indices = @transform_1, window_bounds = array<i64: 4, 4, 4>}, {transform_indices = @transform_2, window_bounds = array<i64: 1, 4, 1>}, {transform_indices = @transform_3, window_bounds = array<i64: 1, 4, 1>}, {transform_indices = @transform_4, window_bounds = array<i64: 1, 4, 4, 64>}]} {
    %c0 = arith.constant 0 : index
    %c0_0 = arith.constant 0 : index
    %c0_1 = arith.constant 0 : index
    %0 = vector.load %arg2[%c0, %c0_0, %c0_1] : memref<4x4x4xbf16, #tpu.memory_space<vmem>>, vector<1x4x4xbf16>
    %1 = vector.shape_cast %0 : vector<1x4x4xbf16> to vector<4x4xbf16>
    %c0_2 = arith.constant 0 : index
    %c0_3 = arith.constant 0 : index
    %c0_4 = arith.constant 0 : index
    %c0_5 = arith.constant 0 : index
    %2 = vector.load %arg1[%c0_2, %c0_3, %c0_4, %c0_5] : memref<1x4x4x64xbf16, #tpu.memory_space<vmem>>, vector<1x1x4x64xbf16>
    %3 = vector.shape_cast %2 : vector<1x1x4x64xbf16> to vector<4x64xbf16>
    %cst = arith.constant dense<0.000000e+00> : vector<4x64xf32>
    %4 = tpu.matmul %1, %3, %cst {dimension_numbers = #tpu.dot_dimension_numbers<[1], [0], [0], [1], [0, 0, 1, 1], [], []>} : vector<4x4xbf16>, vector<4x64xbf16>, vector<4x64xf32> -> vector<4x64xf32>
    %c1 = arith.constant 1 : index
    %c0_6 = arith.constant 0 : index
    %c0_7 = arith.constant 0 : index
    %5 = vector.load %arg2[%c1, %c0_6, %c0_7] : memref<4x4x4xbf16, #tpu.memory_space<vmem>>, vector<1x4x4xbf16>
    %6 = vector.shape_cast %5 : vector<1x4x4xbf16> to vector<4x4xbf16>
    %c0_8 = arith.constant 0 : index
    %c1_9 = arith.constant 1 : index
    %c0_10 = arith.constant 0 : index
    %c0_11 = arith.constant 0 : index
    %7 = vector.load %arg1[%c0_8, %c1_9, %c0_10, %c0_11] : memref<1x4x4x64xbf16, #tpu.memory_space<vmem>>, vector<1x1x4x64xbf16>
    %8 = vector.shape_cast %7 : vector<1x1x4x64xbf16> to vector<4x64xbf16>
    %cst_12 = arith.constant dense<0.000000e+00> : vector<4x64xf32>
    %9 = tpu.matmul %6, %8, %cst_12 {dimension_numbers = #tpu.dot_dimension_numbers<[1], [0], [0], [1], [0, 0, 1, 1], [], []>} : vector<4x4xbf16>, vector<4x64xbf16>, vector<4x64xf32> -> vector<4x64xf32>
    %c2 = arith.constant 2 : index
    %c0_13 = arith.constant 0 : index
    %c0_14 = arith.constant 0 : index
    %10 = vector.load %arg2[%c2, %c0_13, %c0_14] : memref<4x4x4xbf16, #tpu.memory_space<vmem>>, vector<1x4x4xbf16>
    %11 = vector.shape_cast %10 : vector<1x4x4xbf16> to vector<4x4xbf16>
    %c0_15 = arith.constant 0 : index
    %c2_16 = arith.constant 2 : index
    %c0_17 = arith.constant 0 : index
    %c0_18 = arith.constant 0 : index
    %12 = vector.load %arg1[%c0_15, %c2_16, %c0_17, %c0_18] : memref<1x4x4x64xbf16, #tpu.memory_space<vmem>>, vector<1x1x4x64xbf16>
    %13 = vector.shape_cast %12 : vector<1x1x4x64xbf16> to vector<4x64xbf16>
    %cst_19 = arith.constant dense<0.000000e+00> : vector<4x64xf32>
    %14 = tpu.matmul %11, %13, %cst_19 {dimension_numbers = #tpu.dot_dimension_numbers<[1], [0], [0], [1], [0, 0, 1, 1], [], []>} : vector<4x4xbf16>, vector<4x64xbf16>, vector<4x64xf32> -> vector<4x64xf32>
    %c3 = arith.constant 3 : index
    %c0_20 = arith.constant 0 : index
    %c0_21 = arith.constant 0 : index
    %15 = vector.load %arg2[%c3, %c0_20, %c0_21] : memref<4x4x4xbf16, #tpu.memory_space<vmem>>, vector<1x4x4xbf16>
    %16 = vector.shape_cast %15 : vector<1x4x4xbf16> to vector<4x4xbf16>
    %c0_22 = arith.constant 0 : index
    %c3_23 = arith.constant 3 : index
    %c0_24 = arith.constant 0 : index
    %c0_25 = arith.constant 0 : index
    %17 = vector.load %arg1[%c0_22, %c3_23, %c0_24, %c0_25] : memref<1x4x4x64xbf16, #tpu.memory_space<vmem>>, vector<1x1x4x64xbf16>
    %18 = vector.shape_cast %17 : vector<1x1x4x64xbf16> to vector<4x64xbf16>
    %cst_26 = arith.constant dense<0.000000e+00> : vector<4x64xf32>
    %19 = tpu.matmul %16, %18, %cst_26 {dimension_numbers = #tpu.dot_dimension_numbers<[1], [0], [0], [1], [0, 0, 1, 1], [], []>} : vector<4x4xbf16>, vector<4x64xbf16>, vector<4x64xf32> -> vector<4x64xf32>
    %20 = arith.mulf %4, %4 : vector<4x64xf32>
    %21 = arith.addf %4, %9 : vector<4x64xf32>
    %22 = arith.mulf %9, %9 : vector<4x64xf32>
    %23 = arith.addf %20, %22 : vector<4x64xf32>
    %24 = arith.addf %21, %14 : vector<4x64xf32>
    %25 = arith.mulf %14, %14 : vector<4x64xf32>
    %26 = arith.addf %23, %25 : vector<4x64xf32>
    %27 = arith.addf %24, %19 : vector<4x64xf32>
    %28 = arith.mulf %19, %19 : vector<4x64xf32>
    %29 = arith.addf %26, %28 : vector<4x64xf32>
    %cst_27 = arith.constant dense<0.000000e+00> : vector<4xf32>
    %30 = vector.multi_reduction <add>, %27, %cst_27 [1] : vector<4x64xf32> to vector<4xf32>
    %31 = vector.shape_cast %30 : vector<4xf32> to vector<4x1xf32>
    %cst_28 = arith.constant 3.906250e-03 : f32
    %32 = vector.broadcast %cst_28 : f32 to vector<4x1xf32>
    %33 = arith.mulf %31, %32 : vector<4x1xf32>
    %cst_29 = arith.constant dense<0.000000e+00> : vector<4xf32>
    %34 = vector.multi_reduction <add>, %29, %cst_29 [1] : vector<4x64xf32> to vector<4xf32>
    %35 = vector.shape_cast %34 : vector<4xf32> to vector<4x1xf32>
    %cst_30 = arith.constant 3.906250e-03 : f32
    %36 = vector.broadcast %cst_30 : f32 to vector<4x1xf32>
    %37 = arith.mulf %35, %36 : vector<4x1xf32>
    %38 = arith.mulf %33, %33 : vector<4x1xf32>
    %39 = arith.subf %37, %38 : vector<4x1xf32>
    %cst_31 = arith.constant 0.000000e+00 : f32
    %40 = vector.broadcast %cst_31 : f32 to vector<4x1xf32>
    %41 = arith.maximumf %39, %40 : vector<4x1xf32>
    %cst_32 = arith.constant 9.99999997E-7 : f32
    %42 = vector.broadcast %cst_32 : f32 to vector<4x1xf32>
    %43 = arith.addf %41, %42 : vector<4x1xf32>
    %44 = math.rsqrt %43 : vector<4x1xf32>
    %c0_33 = arith.constant 0 : index
    %c0_34 = arith.constant 0 : index
    %c0_35 = arith.constant 0 : index
    %45 = vector.load %arg3[%c0_33, %c0_34, %c0_35] : memref<1x4x1xf32, #tpu.memory_space<vmem>>, vector<1x4x1xf32>
    %46 = vector.shape_cast %45 : vector<1x4x1xf32> to vector<4x1xf32>
    %47 = arith.mulf %46, %44 : vector<4x1xf32>
    %c0_36 = arith.constant 0 : index
    %c0_37 = arith.constant 0 : index
    %c0_38 = arith.constant 0 : index
    %48 = vector.load %arg4[%c0_36, %c0_37, %c0_38] : memref<1x4x1xf32, #tpu.memory_space<vmem>>, vector<1x4x1xf32>
    %49 = vector.shape_cast %48 : vector<1x4x1xf32> to vector<4x1xf32>
    %50 = arith.mulf %33, %47 : vector<4x1xf32>
    %51 = arith.subf %49, %50 : vector<4x1xf32>
    %52 = vector.broadcast %47 : vector<4x1xf32> to vector<4x64xf32>
    %53 = arith.mulf %4, %52 : vector<4x64xf32>
    %54 = vector.broadcast %51 : vector<4x1xf32> to vector<4x64xf32>
    %55 = arith.addf %53, %54 : vector<4x64xf32>
    %cst_39 = arith.constant 2.000000e-01 : f32
    %56 = vector.broadcast %cst_39 : f32 to vector<4x64xf32>
    %57 = arith.mulf %56, %55 : vector<4x64xf32>
    %58 = arith.maximumf %55, %57 : vector<4x64xf32>
    %c0_40 = arith.constant 0 : index
    %c0_41 = arith.constant 0 : index
    %c0_42 = arith.constant 0 : index
    %c0_43 = arith.constant 0 : index
    %59 = vector.load %arg5[%c0_40, %c0_41, %c0_42, %c0_43] : memref<1x4x4x64xf32, #tpu.memory_space<vmem>>, vector<1x1x4x64xf32>
    %60 = vector.shape_cast %59 : vector<1x1x4x64xf32> to vector<4x64xf32>
    %61 = vector.shape_cast %58 : vector<4x64xf32> to vector<1x1x4x64xf32>
    tpu.vector_store %arg5[%c0_40, %c0_41, %c0_42, %c0_43], %61 {strides = array<i32>} : memref<1x4x4x64xf32, #tpu.memory_space<vmem>>, vector<1x1x4x64xf32>,
    %62 = vector.broadcast %47 : vector<4x1xf32> to vector<4x64xf32>
    %63 = arith.mulf %9, %62 : vector<4x64xf32>
    %64 = vector.broadcast %51 : vector<4x1xf32> to vector<4x64xf32>
    %65 = arith.addf %63, %64 : vector<4x64xf32>
    %cst_44 = arith.constant 2.000000e-01 : f32
    %66 = vector.broadcast %cst_44 : f32 to vector<4x64xf32>
    %67 = arith.mulf %66, %65 : vector<4x64xf32>
    %68 = arith.maximumf %65, %67 : vector<4x64xf32>
    %c0_45 = arith.constant 0 : index
    %c1_46 = arith.constant 1 : index
    %c0_47 = arith.constant 0 : index
    %c0_48 = arith.constant 0 : index
    %69 = vector.load %arg5[%c0_45, %c1_46, %c0_47, %c0_48] : memref<1x4x4x64xf32, #tpu.memory_space<vmem>>, vector<1x1x4x64xf32>
    %70 = vector.shape_cast %69 : vector<1x1x4x64xf32> to vector<4x64xf32>
    %71 = vector.shape_cast %68 : vector<4x64xf32> to vector<1x1x4x64xf32>
    tpu.vector_store %arg5[%c0_45, %c1_46, %c0_47, %c0_48], %71 {strides = array<i32>} : memref<1x4x4x64xf32, #tpu.memory_space<vmem>>, vector<1x1x4x64xf32>,
    %72 = vector.broadcast %47 : vector<4x1xf32> to vector<4x64xf32>
    %73 = arith.mulf %14, %72 : vector<4x64xf32>
    %74 = vector.broadcast %51 : vector<4x1xf32> to vector<4x64xf32>
    %75 = arith.addf %73, %74 : vector<4x64xf32>
    %cst_49 = arith.constant 2.000000e-01 : f32
    %76 = vector.broadcast %cst_49 : f32 to vector<4x64xf32>
    %77 = arith.mulf %76, %75 : vector<4x64xf32>
    %78 = arith.maximumf %75, %77 : vector<4x64xf32>
    %c0_50 = arith.constant 0 : index
    %c2_51 = arith.constant 2 : index
    %c0_52 = arith.constant 0 : index
    %c0_53 = arith.constant 0 : index
    %79 = vector.load %arg5[%c0_50, %c2_51, %c0_52, %c0_53] : memref<1x4x4x64xf32, #tpu.memory_space<vmem>>, vector<1x1x4x64xf32>
    %80 = vector.shape_cast %79 : vector<1x1x4x64xf32> to vector<4x64xf32>
    %81 = vector.shape_cast %78 : vector<4x64xf32> to vector<1x1x4x64xf32>
    tpu.vector_store %arg5[%c0_50, %c2_51, %c0_52, %c0_53], %81 {strides = array<i32>} : memref<1x4x4x64xf32, #tpu.memory_space<vmem>>, vector<1x1x4x64xf32>,
    %82 = vector.broadcast %47 : vector<4x1xf32> to vector<4x64xf32>
    %83 = arith.mulf %19, %82 : vector<4x64xf32>
    %84 = vector.broadcast %51 : vector<4x1xf32> to vector<4x64xf32>
    %85 = arith.addf %83, %84 : vector<4x64xf32>
    %cst_54 = arith.constant 2.000000e-01 : f32
    %86 = vector.broadcast %cst_54 : f32 to vector<4x64xf32>
    %87 = arith.mulf %86, %85 : vector<4x64xf32>
    %88 = arith.maximumf %85, %87 : vector<4x64xf32>
    %c0_55 = arith.constant 0 : index
    %c3_56 = arith.constant 3 : index
    %c0_57 = arith.constant 0 : index
    %c0_58 = arith.constant 0 : index
    %89 = vector.load %arg5[%c0_55, %c3_56, %c0_57, %c0_58] : memref<1x4x4x64xf32, #tpu.memory_space<vmem>>, vector<1x1x4x64xf32>
    %90 = vector.shape_cast %89 : vector<1x1x4x64xf32> to vector<4x64xf32>
    %91 = vector.shape_cast %88 : vector<4x64xf32> to vector<1x1x4x64xf32>
    tpu.vector_store %arg5[%c0_55, %c3_56, %c0_57, %c0_58], %91 {strides = array<i32>} : memref<1x4x4x64xf32, #tpu.memory_space<vmem>>, vector<1x1x4x64xf32>,
    return
  }
  func.func @transform_0(%arg0: i32) -> (i32, i32, i32, i32) {
    %c0_i32 = arith.constant 0 : i32
    %c0_i32_0 = arith.constant 0 : i32
    %c0_i32_1 = arith.constant 0 : i32
    %c0_i32_2 = arith.constant 0 : i32
    return %arg0, %c0_i32, %c0_i32_0, %c0_i32_1 : i32, i32, i32, i32
  }
  func.func @transform_1(%arg0: i32) -> (i32, i32, i32) {
    %c0_i32 = arith.constant 0 : i32
    %c0_i32_0 = arith.constant 0 : i32
    %c0_i32_1 = arith.constant 0 : i32
    %c0_i32_2 = arith.constant 0 : i32
    return %c0_i32, %c0_i32_0, %c0_i32_1 : i32, i32, i32
  }
  func.func @transform_2(%arg0: i32) -> (i32, i32, i32) {
    %c0_i32 = arith.constant 0 : i32
    %c0_i32_0 = arith.constant 0 : i32
    %c0_i32_1 = arith.constant 0 : i32
    return %arg0, %c0_i32, %c0_i32_0 : i32, i32, i32
  }
  func.func @transform_3(%arg0: i32) -> (i32, i32, i32) {
    %c0_i32 = arith.constant 0 : i32
    %c0_i32_0 = arith.constant 0 : i32
    %c0_i32_1 = arith.constant 0 : i32
    return %arg0, %c0_i32, %c0_i32_0 : i32, i32, i32
  }
  func.func @transform_4(%arg0: i32) -> (i32, i32, i32, i32) {
    %c0_i32 = arith.constant 0 : i32
    %c0_i32_0 = arith.constant 0 : i32
    %c0_i32_1 = arith.constant 0 : i32
    %c0_i32_2 = arith.constant 0 : i32
    return %arg0, %c0_i32, %c0_i32_0, %c0_i32_1 : i32, i32, i32, i32
  }
}

</mosaic_0001>

<bundles_post_ra>
// kernel: tpu_custom_call.1
= control target key start
LH: loop header
LB: loop body
LE: loop exit
PB: predicated region body
PF: predicated region fallthrough
CT: control target
= control target key end

     0   :  { %9 = vsyncpa [#allocation3], 0  ;;  %s856_s0 = inlined_call_operand.vmem [shape: bf16[2,4,4,64], index: 0, kind: input, shape index: {}]   ;;  %s857_s1 = inlined_call_operand.hbm [shape: bf16[4,4,4], index: 1, kind: input, shape index: {}]   ;;  %s858_s2 = inlined_call_operand.vmem [shape: f32[2,4,1], index: 2, kind: input, shape index: {}]   ;;  %s859_s3 = inlined_call_operand.vmem [shape: f32[2,4,1], index: 3, kind: input, shape index: {}]   ;;  %s860_s4 = inlined_call_operand.hbm [shape: f32[2,4,4,64], index: 4, kind: output, shape index: {}]  }
   0x1   :  { %10 = vsyncpa [#allocation4], 0 }
   0x2   :  { %12 = vsyncpa [#allocation4 + $0x1], 0  ;;  %s741_s15 = smov 0   ;;  %s743_s16 = smov 0  }
   0x3   :  { %s745_s17 = smov 0   ;;  %s747_s18 = smov 0  }
   0x4 LB: > { %s762_s19 = sadd.s32 4294967295, %s708_s18   ;;  %s525_s20 = sadd.s32 4294967294, %s708_s18   ;;  %s708_s18 = sphi %s747_s18, %s866_s18   ;;  %s704_s17 = sphi %s745_s17, %s865_s17   ;;  %s700_s16 = sphi %s743_s16, %s864_s16   ;;  %s696_s15 = sphi %s741_s15, %s863_s15  }
   0x5   : > { %s766_s21 = sadd.s32 1, %s708_s18   ;;  %s124_s22 = sadd.s32 1, %s704_s17 }
   0x6   : > { %s121_s23 = ssub.s32 %s708_s18, %s766_s21  ;;  %p134_p0 = scmp.ne.s32.totalorder %s704_s17, %s700_s16 }
   0x7   : > { %p122_p1 = scmp.eq.s32.totalorder %s121_s23, 0  ;;  %p135_p2 = scmp.eq.s32.totalorder %s762_s19, 1 }
   0x8   : > { %p140_p3 = scmp.ne.s32.totalorder %s700_s16, %s696_s15  ;;  %p141_p4 = scmp.eq.s32.totalorder %s525_s20, 1 }
   0x9   : > { %s777_s24 = scalar_select %p122_p1, %s704_s17, %s124_s22  }
   0xa   : > { %p779_p5 = por %p135_p2, %p134_p0  ;;  %p783_p6 = por %p141_p4, %p140_p3 }
   0xb   : > { %p526_p7 = scmp.ge.s32.totalorder %s708_s18, 1  ;;  %p148_p8 = scmp.lt.s32.totalorder %s708_s18, 3 }
   0xc   : > { %p567_p9 = scmp.eq.s32.totalorder %s762_s19, 0  ;;  %s159_s29 = sshll.u32 %s857_s1, 4  ;;  %s160_s29 = int_to_ptr.hbm [resolvable:$true] %s159_s29 }
   0xd   : > { %p149_p10 = pnand %p526_p7, %p148_p8  ;;  %s710_s30 = smov [#allocation2]  }
   0xe   : > { %s161_s5 = sshll.u32 %s710_s30, 4  ;;  %s711_s6 = smov 32   ;;  %s162_s5 = int_to_ptr.vmem [resolvable:$true] %s161_s5 }
   0xf   : > { %p559_p11 = pneg %p149_p10  ;;  %s712_s7 = smov 2  }
  0x10   : > { %199 = sbr.rel (%p149_p10) target bundleno = 459 (0x1cb), region = 36 }
  0x11   : > { %p560_p12 = pnand %p567_p9, %p559_p11 }
  0x13   : > { %562 = dma.hbm_to_vmem [thread:$0]  (!%p560_p12), %s160_s29, 128, %s162_s5, [#allocation3], %s711_s6, %s711_s6, %s712_s7  }
  0x15   : > { %687 = dma.done.wait (%p567_p9), [#allocation3], 128  }
  0x16   : > { %689 = vsyncadd (%p567_p9), [#allocation3], 4294967168  ;;  %p234_p13 = scmp.lt.s32.totalorder %s762_s19, 1  ;;  %vm254_vm0 = vcmask 1041408   ;;  %v248_v8 = vld [vmem:[#allocation2] sm:$0x3] }
  0x17   : > { %vm250_vm1 = vcmask 31744   ;;  %v272_v9 = vld [vmem:[#allocation2 + $0x2] sm:$0x3]  ;;  %v295_v10 = vld [vmem:[#allocation2 + $0x4] sm:$0x3]  ;;  %vm350_vm2 = vcmask 519168  }
  0x18   : > { %s801_s8 = scalar_select %p234_p13, %s762_s19, 1  ;;  %v318_v11 = vld [vmem:[#allocation2 + $0x6] sm:$0x3]  ;;  %v713_v32 = vmov 0  }
  0x19   : > { %608 = vset.pattern.permute.xlu1 %v713_v32  ;;  %609 = vset.pattern.permute.xlu0 %v713_v32  ;;  %s231_s29 = sand.u32 1, %s700_s16   ;;  %s552_s5 = sshll.u32 %s762_s19, 4 }
  0x1a   : > { %s551_s9 = sshll.u32 %s801_s8, 3  ;;  %s534_s13 = sshll.u32 %s801_s8, 2 }
  0x1b   : > { %s238_s12 = scalar_lea.vmem %s856_s0, %s551_s9  ;;  %s242_s22 = scalar_lea.vmem %s858_s2, %s534_s13 }
  0x1c   : > { %v249_v0 = vld [vmem:[%s238_s12] sm:$0x3]  ;;  %v537_v1 = vld [vmem:[%s238_s12 + $0x2] sm:$0x3]  ;;  %v539_v2 = vld [vmem:[%s238_s12 + $0x4] sm:$0x3]  ;;  %s246_s28 = scalar_lea.vmem %s859_s3, %s534_s13  ;;  %s423_s8 = scalar_lea.hbm %s860_s4, %s552_s5 }
  0x1d   : > { %v256_v3 = vsel %vm254_vm0, %v249_v0, 0  ;;  %v279_v4 = vsel %vm254_vm0, %v537_v1, 0  ;;  %v302_v5 = vsel %vm254_vm0, %v539_v2, 0  ;;  %v541_v6 = vld [vmem:[%s238_s12 + $0x6] sm:$0x3]  ;;  %s531_s30 = sshll.u32 %s231_s29, 4 }
  0x1e   : > { %265 = vmatpush.bf16.msra.mxu0 %v256_v3  ;;  %288 = vmatpush.bf16.msra.mxu1 %v279_v4  ;;  %v325_v7 = vsel %vm254_vm0, %v541_v6, 0  ;;  %v373_v47 = vld [vmem:[%s242_s22] sm:$0xf]  ;;  %s233_s9 = scalar_lea.vmem [#allocation5], %s531_s30  ;;  %s426_s10 = sshll.u32 %s423_s8, 4  ;;  %s427_s10 = int_to_ptr.hbm [resolvable:$true] %s426_s10 }
  0x1f   : > { %311 = vmatpush.bf16.msra.mxu2 %v302_v5  ;;  %334 = vmatpush.bf16.msra.mxu3 %v325_v7  ;;  %v375_v51 = vld [vmem:[%s246_s28] sm:$0xf]  ;;  %s424_s19 = sshll.u32 %s233_s9, 4  ;;  %s412_s11 = scalar_lea.sflag [#allocation4], %s231_s29  ;;  %s425_s19 = int_to_ptr.vmem [resolvable:$true] %s424_s19 }
  0x20   : > { %s656_s12 = sshra.s32 %s427_s10, 4  ;;  %s662_s22 = scalar_lea.hbm %s860_s4, 32  ;;  %s657_s12 = int_to_ptr.hbm [resolvable:$true] %s656_s12 }
  0x21   : > { %536 = vmatmul.msk.bf16.vlgmr.msra.gmra.mxu0 %vm250_vm1, %v248_v8  ;;  %538 = vmatmul.msk.bf16.vlgmr.msra.gmra.mxu1 %vm250_vm1, %v272_v9  ;;  %s658_s13 = scalar_lea.hbm %s657_s12, 16  ;;  %p663_p3 = scmp.lt.s32.totalorder %s657_s12, %s860_s4 }
  0x22   : > { %540 = vmatmul.msk.bf16.vlgmr.msra.gmra.mxu2 %vm250_vm1, %v295_v10  ;;  %542 = vmatmul.msk.bf16.vlgmr.msra.gmra.mxu3 %vm250_vm1, %v318_v11  ;;  %p659_p0 = scmp.ne.s32.totalorder %s657_s12, %s658_s13  ;;  %p664_p4 = scmp.lt.s32.totalorder %s662_s22, %s658_s13 }
  0x24   : > { %p660_p1 = pnand %p659_p0, %p779_p5  ;;  %p665_p7 = por %p664_p4, %p663_p3 }
  0x26   : > { %p661_p2 = pneg %p660_p1 }
  0x28   : > { %p666_p8 = pnand %p665_p7, %p661_p2 }
  0x9e   : > { %v267_v12 = vpop.f32.mrf.mxu0  ;;  %v290_v13 = vpop.f32.mrf.mxu1 }
  0x9f   : > { %v340_v14 = vmul.f32 %v267_v12, %v267_v12  ;;  %v341_v15 = vadd.f32 %v290_v13, %v267_v12  ;;  %v342_v16 = vmul.f32 %v290_v13, %v290_v13 }
  0xa1   : > { %v343_v19 = vadd.f32 %v342_v16, %v340_v14 }
  0xa5   : > { %v313_v17 = vpop.f32.mrf.mxu2  ;;  %v336_v18 = vpop.f32.mrf.mxu3 }
  0xa6   : > { %v344_v20 = vadd.f32 %v341_v15, %v313_v17  ;;  %v345_v21 = vmul.f32 %v313_v17, %v313_v17  ;;  %v269_v22 = vpop.f32.mrf.mxu0  ;;  %v292_v23 = vpop.f32.mrf.mxu1  ;;  %v348_v25 = vmul.f32 %v336_v18, %v336_v18 }
  0xa8   : > { %v347_v24 = vadd.f32 %v344_v20, %v336_v18  ;;  %v346_v27 = vadd.f32 %v345_v21, %v343_v19 }
  0xaa   : > { %v351_v26 = vsel %vm350_vm2, %v347_v24, 0.0  ;;  %v349_v30 = vadd.f32 %v348_v25, %v346_v27 }
  0xab   : > { %352 = vadd.xlane.f32.xlu0 %v351_v26 }
  0xac   : > { %v355_v31 = vsel %vm350_vm2, %v349_v30, 0.0 }
  0xad   : > { %v315_v28 = vpop.f32.mrf.mxu2  ;;  %v338_v29 = vpop.f32.mrf.mxu3 }
  0xb3   : > { %356 = vadd.xlane.f32.xlu0 %v355_v31 }
 0x11e   : > { %v353_v33 = vpop.xlane.xlu0 %352 }
 0x11f   : > { %v354_v34 = vmul.f32 0.00390625, %v353_v33 }
 0x121   : > { %v359_v36 = vmul.f32 %v354_v34, %v354_v34 }
 0x126   : > { %v357_v35 = vpop.xlane.xlu0 %356 }
 0x127   : > { %v358_v37 = vmul.f32 0.00390625, %v357_v35 }
 0x129   : > { %v360_v38 = vsub.f32 %v358_v37, %v359_v36 }
 0x12b   : > { %v361_v39 = vmax.f32 %v360_v38, 0.0 }
 0x12d   : > { %v362_v40 = vadd.f32 1e-06, %v361_v39 }
 0x12f   : > { %610 = vrsqrt.f32 %v362_v40  ;;  %vm369_vm4 = vweird.f32 %v362_v40 }
 0x135   : > { %v611_v41 = vpop.eup %610 }
 0x136   : > { %v364_v42 = vmul.f32 %v611_v41, %v362_v40  ;;  %vm370_vm3 = vweird.f32 %v611_v41 }
 0x137   : > { %vm371_vm5 = vmor %vm369_vm4, %vm370_vm3 }
 0x138   : > { %v365_v43 = vmul.f32 %v611_v41, %v364_v42 }
 0x13a   : > { %v366_v44 = vmul.f32 0.5, %v365_v43 }
 0x13c   : > { %v367_v45 = vsub.f32 1.5, %v366_v44 }
 0x13e   : > { %v368_v46 = vmul.f32 %v611_v41, %v367_v45 }
 0x140   : > { %v372_v48 = vsel %vm371_vm5, %v611_v41, %v368_v46 }
 0x141   : > { %v374_v49 = vmul.f32 %v373_v47, %v372_v48 }
 0x143   : > { %380 = vperm.xlu1 %608, %v374_v49   ;;  %v376_v50 = vmul.f32 %v374_v49, %v354_v34 }
 0x145   : > { %v377_v52 = vsub.f32 %v375_v51, %v376_v50 }
 0x14b   : > { %386 = vperm.xlu1 %608, %v377_v52  }
 0x1b5   : > { %v381_v53 = vpop.permute.xlu1 %380 }
 0x1b6   : > { %v383_v54 = vmul.f32 %v381_v53, %v267_v12  ;;  %v393_v55 = vmul.f32 %v381_v53, %v290_v13  ;;  %v399_v56 = vmul.f32 %v381_v53, %v313_v17  ;;  %v405_v57 = vmul.f32 %v381_v53, %v336_v18 }
 0x1bd   : > { %v387_v58 = vpop.permute.xlu1 %386 }
 0x1be   : > { %v389_v59 = vadd.f32 %v387_v58, %v383_v54  ;;  %v394_v60 = vadd.f32 %v393_v55, %v387_v58  ;;  %v400_v61 = vadd.f32 %v399_v56, %v387_v58  ;;  %v406_v62 = vadd.f32 %v405_v57, %v387_v58 }
 0x1c0   : > { %v390_v63 = vmul.f32 0.2, %v389_v59  ;;  %v395_v0 = vmul.f32 0.2, %v394_v60  ;;  %v401_v1 = vmul.f32 0.2, %v400_v61 }
 0x1c1   : > { %v407_v2 = vmul.f32 0.2, %v406_v62 }
 0x1c2   : > { %v391_v3 = vmax.f32 %v389_v59, %v390_v63  ;;  %v396_v4 = vmax.f32 %v394_v60, %v395_v0  ;;  %v402_v5 = vmax.f32 %v400_v61, %v401_v1 }
 0x1c3   : > { %v408_v6 = vmax.f32 %v406_v62, %v407_v2 }
 0x1c4   : > { %392 = vst.msk [vmem:[%s233_s9] sm:$0xf] %vm350_vm2, %v391_v3 }
 0x1c5   : > { %543 = vst.msk [vmem:[%s233_s9 + $0x4] sm:$0xf] %vm350_vm2, %v396_v4 }
 0x1c6   : > { %544 = vst.msk [vmem:[%s233_s9 + $0x8] sm:$0xf] %vm350_vm2, %v402_v5 }
 0x1c7   : > { %545 = vst.msk [vmem:[%s233_s9 + $0xc] sm:$0xf] %vm350_vm2, %v408_v6 }
 0x1c8   : > { %669 = shalt.err (!%p666_p8)
}
 0x1c9   : > { %s714_s28 = smov 64   ;;  %s715_s29 = smov 4  }
 0x1ca   : > { %557 = dma.vmem_to_hbm [thread:$0]  (%p779_p5), %s425_s19, 256, %s427_s10, %s412_s11, %s714_s28, %s714_s28, %s715_s29  }
 0x1cb PF: > { %p569_p9 = scmp.ge.s32.totalorder %s708_s18, 2  ;;  %s441_s30 = sand.u32 1, %s696_s15  }
 0x1cc   : > { %s442_s5 = scalar_lea.sflag [#allocation4], %s441_s30 }
 0x1cd   : > { %p564_p10 = pnand %p569_p9, %p783_p6 }
 0x1cf   : > { %p565_p11 = pneg %p564_p10 }
 0x1d1   : > { %691 = dma.done.wait (%p565_p11), %s442_s5, 256  }
 0x1d2   : > { %693 = vsyncadd (%p565_p11), %s442_s5, 4294967040  ;;  %p15_p12 = scmp.ge.s32.totalorder %s766_s21, 4   ;;  %s863_s15 = smov %s700_s16 }
 0x1d3   : > { %s864_s16 = smov %s704_s17  ;;  %s865_s17 = smov %s777_s24 }
 0x1d4   : > { %s866_s18 = smov %s766_s21  ;;  %17 = sbr.rel (!%p15_p12) target bundleno = 4 (0x4), region = 91 }
 0x1d9   :  { %448 = vsyncpa [#allocation3], 1 }
 0x1da   :  { %450 = vsyncpa [#allocation3 + $0x1], 1 }
 0x1db   :  { %451 = vsyncpa [#allocation4], 1 }
 0x1dc   :  { %453 = vsyncpa [#allocation4 + $0x1], 1 }

</bundles_post_ra>
